<compile_context>
chip_gen: v7x
topology: tpu7x:2x2x1
jax: 0.10.0
libtpu: 0.0.40
codegen_flags: <defaults>
</compile_context>

<pallas_src>
import math

import jax
import jax.numpy as jnp
from jax.experimental import pallas as pl
from jax.experimental.pallas import tpu as pltpu

LANE = 128


def _round_up(x, m):
    return (x + m - 1) // m * m


def _vmem_limit_bytes():
    """Per-generation scoped-VMEM budget with headroom for compiler scratch."""
    try:
        cap = int(pltpu.get_tpu_info().vmem_capacity_bytes)
    except Exception:
        cap = None
    if cap is None:
        return 48 * 1024 * 1024  # safe everywhere
    return int(max(32 * 1024 * 1024,
                   min(cap - 16 * 1024 * 1024, 100 * 1024 * 1024)))


def _pick_tiles(n_nodes):
    """Auto tile sizes. Propagation tiles grow to 1024 but keep >= 2 row tiles
    (v7x dual-TC sharding); the NN phase gets a bigger, overhead-amortizing
    row tile.  All powers of two so they divide the padded node count."""
    tm = 256
    while tm * 4 <= n_nodes and tm < 1024:
        tm *= 2
    tk = 256
    while tk * 2 <= n_nodes and tk < 1024:
        tk *= 2
    tm_nn = 512
    while tm_nn * 2 <= n_nodes and tm_nn < 4096:
        tm_nn *= 2
    return tm, tk, tm_nn


# ---------------------------------------------------------------------------
# Kernel 1: fused feature transformation  h -> relu(...relu(relu(h@W0)@W1)...)
# ---------------------------------------------------------------------------
def _make_transform_kernel(n_weights):
    def kernel(*refs):
        x_ref = refs[0]
        w_refs = refs[1:1 + n_weights]
        o_ref = refs[1 + n_weights]
        h = x_ref[...]                                      # [tm, F0] bf16
        for w_ref in w_refs:
            acc = jnp.dot(h, w_ref[...], preferred_element_type=jnp.float32)
            h = jnp.maximum(acc, 0.0).astype(x_ref.dtype)   # relu, back to bf16
        o_ref[...] = h.astype(o_ref.dtype)
    return kernel


def fused_transform(x, weights, *, tm, vmem_limit):
    """relu-chain of matmuls over a row-tiled grid; all weights VMEM-resident.
    Input block's last dim equals the full array dim (exempt from the 128
    rule) so the raw feature width is read from HBM unpadded."""
    M, F0 = x.shape
    assert M % tm == 0
    f_out = weights[-1].shape[1]

    in_specs = [pl.BlockSpec((tm, F0), lambda i: (i, 0))]
    for w in weights:
        # Constant index map -> weight block stays resident across row tiles.
        in_specs.append(pl.BlockSpec(w.shape, lambda i: (0, 0)))

    flops = 2 * M * sum(int(w.shape[0]) * int(w.shape[1]) for w in weights)
    bytes_accessed = int(x.size * x.dtype.itemsize
                         + sum(w.size * w.dtype.itemsize for w in weights)
                         + M * f_out * 2)

    return pl.pallas_call(
        _make_transform_kernel(len(weights)),
        out_shape=jax.ShapeDtypeStruct((M, f_out), jnp.bfloat16),
        grid_spec=pltpu.PrefetchScalarGridSpec(
            num_scalar_prefetch=0,
            grid=(M // tm,),
            in_specs=in_specs,
            out_specs=pl.BlockSpec((tm, f_out), lambda i: (i, 0)),
        ),
        compiler_params=pltpu.CompilerParams(
            dimension_semantics=("parallel",),
            vmem_limit_bytes=vmem_limit,
        ),
        cost_estimate=pl.CostEstimate(
            flops=flops, transcendentals=0, bytes_accessed=bytes_accessed),
    )(x, *weights)


# ---------------------------------------------------------------------------
# Kernel 2: block-sparse propagation  z = A @ h
# ---------------------------------------------------------------------------
def _propagate_bf16_kernel(blk_idx_ref, blk_cnt_ref, a_ref, h_ref, o_ref, acc_ref):
    """bf16 output: accumulate in an f32 VMEM scratch, cast on writeback."""
    i = pl.program_id(0)   # row tile of A / output
    j = pl.program_id(1)   # slot in this row tile's non-zero block list

    @pl.when(j == 0)
    def _init():
        acc_ref[...] = jnp.zeros_like(acc_ref)

    @pl.when(j < blk_cnt_ref[i])
    def _accumulate():
        acc_ref[...] += jnp.dot(a_ref[...], h_ref[...],
                                preferred_element_type=jnp.float32)

    @pl.when(j == pl.num_programs(1) - 1)
    def _writeback():
        o_ref[...] = acc_ref[...].astype(o_ref.dtype)


def _propagate_f32_kernel(blk_idx_ref, blk_cnt_ref, a_ref, h_ref, o_ref):
    """f32 output: accumulate directly into the resident output block
    (output BlockSpec is constant across the j axis), no scratch copy."""
    i = pl.program_id(0)
    j = pl.program_id(1)

    @pl.when(j == 0)
    def _init():
        o_ref[...] = jnp.zeros_like(o_ref)

    @pl.when(j < blk_cnt_ref[i])
    def _accumulate():
        o_ref[...] += jnp.dot(a_ref[...], h_ref[...],
                              preferred_element_type=jnp.float32)


def build_block_tables(adj, tm, tk):
    """Per-row-tile list of non-zero (tm x tk) column-block indices (+ counts).

    HOST-SIDE preprocessing on a CONCRETE adjacency (uses int()/Python max();
    must not be called under jit with traced values).  The index table is
    returned FLATTENED to 1-D so it lives compactly in SMEM."""
    M, K = adj.shape
    n_row, n_col = M // tm, K // tk
    nz = jnp.any(adj.reshape(n_row, tm, n_col, tk) != 0, axis=(1, 3))
    cnt = jnp.sum(nz, axis=1).astype(jnp.int32)                         # [n_row]
    max_cnt = max(int(jnp.max(cnt)), 1)
    order = jnp.argsort(jnp.where(nz, 0, 1), axis=1).astype(jnp.int32)  # nz first
    idx = order[:, :max_cnt]
    # Pad unused slots with the row's last valid block index so consecutive
    # grid steps revisit an already-resident block (no extra DMA).
    last_valid = idx[jnp.arange(n_row), jnp.maximum(cnt - 1, 0)]
    slot = jnp.arange(max_cnt, dtype=jnp.int32)[None, :]
    idx = jnp.where(slot < cnt[:, None], idx, last_valid[:, None]).astype(jnp.int32)
    return idx.reshape(-1), cnt, max_cnt


def propagate(adj, h, blk_idx_flat, blk_cnt, *, tm, tk, max_blocks, out_dtype,
              vmem_limit):
    """z = A @ h: A row-tiled (tm x tk) bf16, narrow h block per K step,
    zero blocks skipped via a flattened scalar-prefetched block table."""
    M, K = adj.shape
    K2, F = h.shape
    assert K == K2 and M % tm == 0 and K % tk == 0
    n_row = M // tm
    assert blk_idx_flat.shape == (n_row * max_blocks,)

    f32_out = jnp.dtype(out_dtype) == jnp.dtype(jnp.float32)
    kernel = _propagate_f32_kernel if f32_out else _propagate_bf16_kernel
    scratch = [] if f32_out else [pltpu.VMEM((tm, F), jnp.float32)]

    flops = int(2 * M * K * F)
    bytes_accessed = int(adj.size * adj.dtype.itemsize
                         + h.size * h.dtype.itemsize
                         + M * F * jnp.dtype(out_dtype).itemsize)

    return pl.pallas_call(
        kernel,
        out_shape=jax.ShapeDtypeStruct((M, F), out_dtype),
        grid_spec=pltpu.PrefetchScalarGridSpec(
            num_scalar_prefetch=2,
            grid=(n_row, max_blocks),
            in_specs=[
                pl.BlockSpec(
                    (tm, tk),
                    lambda i, j, bidx, bcnt: (i, bidx[i * max_blocks + j])),
                pl.BlockSpec(
                    (tk, F),
                    lambda i, j, bidx, bcnt: (bidx[i * max_blocks + j], 0)),
            ],
            out_specs=pl.BlockSpec((tm, F), lambda i, j, bidx, bcnt: (i, 0)),
            scratch_shapes=scratch,
        ),
        compiler_params=pltpu.CompilerParams(
            dimension_semantics=("parallel", "arbitrary"),
            vmem_limit_bytes=vmem_limit,
        ),
        cost_estimate=pl.CostEstimate(
            flops=flops, transcendentals=0, bytes_accessed=bytes_accessed),
    )(blk_idx_flat, blk_cnt, adj, h)


# ---------------------------------------------------------------------------
# DecoupleGCN forward
# ---------------------------------------------------------------------------
def decouple_gcn_forward(features, adj, weights, *, tm=None, tk=None, tm_nn=None):
    N, in_dim = features.shape
    out_dim = weights[-1].shape[1]
    n_layers = len(weights)

    auto_tm, auto_tk, auto_tm_nn = _pick_tiles(N)
    tm = tm or auto_tm
    tk = tk or auto_tk
    tm_nn = tm_nn or auto_tm_nn
    vmem_limit = _vmem_limit_bytes()

    def pad2(x, rows, cols):
        return jnp.pad(x, ((0, rows - x.shape[0]), (0, cols - x.shape[1])))

    # Zero-pad node count to the largest tile (exact: relu(0)=0, A @ 0 = 0).
    # The INPUT feature dim is only 8-aligned (read unpadded from HBM); hidden
    # and output dims are padded to 128 lanes for lane-dense stores.
    n_pad = _round_up(N, max(tm, tk, tm_nn))
    dims = [in_dim] + [w.shape[1] for w in weights]
    dims_p = [_round_up(in_dim, 8)] + [_round_up(d, LANE) for d in dims[1:]]

    x_p = pad2(features, n_pad, dims_p[0]).astype(jnp.bfloat16)
    w_p = [pad2(w, dims_p[i], dims_p[i + 1]).astype(jnp.bfloat16)
           for i, w in enumerate(weights)]
    adj_f32 = pad2(adj, n_pad, n_pad)
    adj_bf = adj_f32.astype(jnp.bfloat16)

    # Phase 1: fused transformation (all relu(h @ W) layers in one kernel).
    h = fused_transform(x_p, w_p, tm=tm_nn, vmem_limit=vmem_limit)

    # Phase 2: block-sparse propagation, once per layer.
    blk_idx_flat, blk_cnt, max_blocks = build_block_tables(adj_f32, tm, tk)
    for l in range(n_layers):
        last = l == n_layers - 1
        h = propagate(adj_bf, h, blk_idx_flat, blk_cnt, tm=tm, tk=tk,
                      max_blocks=max_blocks,
                      out_dtype=jnp.float32 if last else jnp.bfloat16,
                      vmem_limit=vmem_limit)

    return h[:N, :out_dim]


def xavier_uniform(key, fan_in, fan_out):
    bound = math.sqrt(6.0 / (fan_in + fan_out))
    return jax.random.uniform(key, (fan_in, fan_out), dtype=jnp.float32,
                              minval=-bound, maxval=bound)


if __name__ == "__main__":
    N, IN_DIM, HIDDEN, OUT_DIM = 512, 32, 16, 8

    key = jax.random.PRNGKey(0)
    k_feat, k_adj, k_w0, k_w1 = jax.random.split(key, 4)

    features = jax.random.normal(k_feat, (N, IN_DIM), dtype=jnp.float32)

    # Sparse, block-structured adjacency: nodes [0, 256) never point to nodes
    # [256, 512), so with 256-wide column tiles one block of A is all zero.
    half = N // 2
    rows_lo = (jnp.arange(N) < half)[:, None]
    cols_hi = (jnp.arange(N) >= half)[None, :]
    allowed = jnp.logical_not(rows_lo & cols_hi).astype(jnp.float32)
    rand_edges = (jax.random.uniform(k_adj, (N, N)) < 0.05).astype(jnp.float32)
    adj = jnp.minimum(rand_edges * allowed + jnp.eye(N, dtype=jnp.float32), 1.0)
    adj = adj / jnp.sum(adj, axis=1, keepdims=True)   # row-normalize

    # nlayers=2 -> [in_dim, hidden], [hidden, out_dim] (xavier-uniform)
    weights = [xavier_uniform(k_w0, IN_DIM, HIDDEN),
               xavier_uniform(k_w1, HIDDEN, OUT_DIM)]

    # Reference with the same precision policy (bf16 operands, f32 accumulate).
    h_ref = features.astype(jnp.bfloat16)
    for w in weights:
        h_ref = jnp.maximum(
            jnp.dot(h_ref, w.astype(jnp.bfloat16),
                    preferred_element_type=jnp.float32), 0.0).astype(jnp.bfloat16)
    adj_ref = adj.astype(jnp.bfloat16)
    for l in range(len(weights)):
        z = jnp.dot(adj_ref, h_ref, preferred_element_type=jnp.float32)
        h_ref = z if l == len(weights) - 1 else z.astype(jnp.bfloat16)

    # 1) Auto-picked (performance) tiles.
    out = decouple_gcn_forward(features, adj, weights)
    out = jax.block_until_ready(out)
    assert out.shape == (N, OUT_DIM)
    assert bool(jnp.all(jnp.isfinite(out)))
    assert jnp.allclose(out, h_ref, atol=1e-2, rtol=1e-2), \
        float(jnp.max(jnp.abs(out - h_ref)))

    # 2) Small explicit tiles so the toy graph exercises the zero-block-skip
    #    path of the block-sparse propagation kernel (n_col > 1).
    out2 = decouple_gcn_forward(features, adj, weights, tm=256, tk=256, tm_nn=512)
    out2 = jax.block_until_ready(out2)
    assert jnp.allclose(out2, h_ref, atol=1e-2, rtol=1e-2), \
        float(jnp.max(jnp.abs(out2 - h_ref)))

    print("KERNEL_OK")
</pallas_src>

<mosaic_0001>
module attributes {stable_mosaic.version = 11 : i64} {
  func.func @kernel(%arg0: i32, %arg1: memref<512x32xbf16, #tpu.memory_space<vmem>>, %arg2: memref<32x128xbf16, #tpu.memory_space<vmem>>, %arg3: memref<128x128xbf16, #tpu.memory_space<vmem>>, %arg4: memref<512x128xbf16, #tpu.memory_space<vmem>>) attributes {dimension_semantics = [#tpu.dimension_semantics<parallel>], iteration_bounds = array<i64: 1>, scalar_prefetch = 0 : i64, scratch_operands = 0 : i64, tpu.core_type = #tpu.core_type<tc>, window_params = [{transform_indices = @transform_0, window_bounds = array<i64: 512, 32>}, {pipeline_mode = #tpu.pipeline_mode<synchronous>, transform_indices = @transform_1, window_bounds = array<i64: 32, 128>}, {pipeline_mode = #tpu.pipeline_mode<synchronous>, transform_indices = @transform_2, window_bounds = array<i64: 128, 128>}, {transform_indices = @transform_3, window_bounds = array<i64: 512, 128>}]} {
    %c0 = arith.constant 0 : index
    %c0_0 = arith.constant 0 : index
    %0 = vector.load %arg1[%c0, %c0_0] : memref<512x32xbf16, #tpu.memory_space<vmem>>, vector<512x32xbf16>
    %c0_1 = arith.constant 0 : index
    %c0_2 = arith.constant 0 : index
    %1 = vector.load %arg2[%c0_1, %c0_2] : memref<32x128xbf16, #tpu.memory_space<vmem>>, vector<32x128xbf16>
    %cst = arith.constant dense<0.000000e+00> : vector<512x128xf32>
    %2 = tpu.matmul %0, %1, %cst {dimension_numbers = #tpu.dot_dimension_numbers<[1], [0], [0], [1], [0, 0, 1, 1], [], []>} : vector<512x32xbf16>, vector<32x128xbf16>, vector<512x128xf32> -> vector<512x128xf32>
    %cst_3 = arith.constant 0.000000e+00 : f32
    %3 = vector.broadcast %cst_3 : f32 to vector<512x128xf32>
    %4 = arith.maximumf %2, %3 : vector<512x128xf32>
    %5 = arith.truncf %4 : vector<512x128xf32> to vector<512x128xbf16>
    %c0_4 = arith.constant 0 : index
    %c0_5 = arith.constant 0 : index
    %6 = vector.load %arg3[%c0_4, %c0_5] : memref<128x128xbf16, #tpu.memory_space<vmem>>, vector<128x128xbf16>
    %cst_6 = arith.constant dense<0.000000e+00> : vector<512x128xf32>
    %7 = tpu.matmul %5, %6, %cst_6 {dimension_numbers = #tpu.dot_dimension_numbers<[1], [0], [0], [1], [0, 0, 1, 1], [], []>} : vector<512x128xbf16>, vector<128x128xbf16>, vector<512x128xf32> -> vector<512x128xf32>
    %cst_7 = arith.constant 0.000000e+00 : f32
    %8 = vector.broadcast %cst_7 : f32 to vector<512x128xf32>
    %9 = arith.maximumf %7, %8 : vector<512x128xf32>
    %10 = arith.truncf %9 : vector<512x128xf32> to vector<512x128xbf16>
    %c0_8 = arith.constant 0 : index
    %c0_9 = arith.constant 0 : index
    %11 = vector.load %arg4[%c0_8, %c0_9] : memref<512x128xbf16, #tpu.memory_space<vmem>>, vector<512x128xbf16>
    tpu.vector_store %arg4[%c0_8, %c0_9], %10 {strides = array<i32>} : memref<512x128xbf16, #tpu.memory_space<vmem>>, vector<512x128xbf16>,
    return
  }
  func.func @transform_0(%arg0: i32) -> (i32, i32) {
    %c0_i32 = arith.constant 0 : i32
    %c0_i32_0 = arith.constant 0 : i32
    return %arg0, %c0_i32 : i32, i32
  }
  func.func @transform_1(%arg0: i32) -> (i32, i32) {
    %c0_i32 = arith.constant 0 : i32
    %c0_i32_0 = arith.constant 0 : i32
    %c0_i32_1 = arith.constant 0 : i32
    return %c0_i32, %c0_i32_0 : i32, i32
  }
  func.func @transform_2(%arg0: i32) -> (i32, i32) {
    %c0_i32 = arith.constant 0 : i32
    %c0_i32_0 = arith.constant 0 : i32
    %c0_i32_1 = arith.constant 0 : i32
    return %c0_i32, %c0_i32_0 : i32, i32
  }
  func.func @transform_3(%arg0: i32) -> (i32, i32) {
    %c0_i32 = arith.constant 0 : i32
    %c0_i32_0 = arith.constant 0 : i32
    return %arg0, %c0_i32 : i32, i32
  }
}

</mosaic_0001>

<bundles_post_ra>
// kernel: tpu_custom_call.1
= control target key start
LH: loop header
LB: loop body
LE: loop exit
PB: predicated region body
PF: predicated region fallthrough
CT: control target
= control target key end

     0   :  { %vm256_vm0 = vcmask 261120   ;;  %s2384_s0 = inlined_call_operand.vmem [shape: bf16[512,32], index: 0, kind: input, shape index: {}]   ;;  %s2385_s1 = inlined_call_operand.vmem [shape: bf16[32,128], index: 1, kind: input, shape index: {}]   ;;  %s2386_s2 = inlined_call_operand.vmem [shape: bf16[128,128], index: 2, kind: input, shape index: {}]   ;;  %s2387_s3 = inlined_call_operand.hbm [shape: bf16[512,128], index: 3, kind: output, shape index: {}]  }
   0x1   :  { %v2125_v0 = vld [vmem:[%s2385_s1] sm:$0xff]   ;;  %v2126_v1 = vld [vmem:[%s2385_s1 + $0x8] sm:$0xff]   ;;  %v2129_v4 = vld [vmem:[%s2384_s0 + $0x10] sm:$0xff]  }
   0x2   :  { %1958 = vmatprep.subr.bf16.mxu0 %v2125_v0  ;;  %v2127_v2 = vld [vmem:[%s2384_s0] sm:$0xff]   ;;  %v2128_v3 = vld [vmem:[%s2384_s0 + $0x8] sm:$0xff]   ;;  %v2130_v5 = vld [vmem:[%s2384_s0 + $0x18] sm:$0xff]  }
   0x3   :  { %1959 = vmatpush3.bf16.msra.mxu0 %v2125_v0  ;;  %1962 = vmatprep.mubr.msk.bf16.mxu0 %vm256_vm0, %v2127_v2  ;;  %v2131_v6 = vld [vmem:[%s2384_s0 + $0x20] sm:$0xff]   ;;  %v2132_v7 = vld [vmem:[%s2384_s0 + $0x28] sm:$0xff]   ;;  %v2133_v8 = vld [vmem:[%s2384_s0 + $0x30] sm:$0xff]  }
   0x4   :  { %1960 = vmatprep.subr.bf16.mxu0 %v2126_v1  ;;  %v2134_v9 = vld [vmem:[%s2384_s0 + $0x38] sm:$0xff]   ;;  %v2135_v10 = vld [vmem:[%s2384_s0 + $0x40] sm:$0xff]   ;;  %v2160_v12 = vld [vmem:[%s2386_s2 + $0x8] sm:$0xff]  }
   0x5   :  { %v2159_v11 = vld [vmem:[%s2386_s2] sm:$0xff]   ;;  %v2136_v13 = vld [vmem:[%s2384_s0 + $0x48] sm:$0xff]   ;;  %v2161_v14 = vld [vmem:[%s2386_s2 + $0x10] sm:$0xff]  }
   0x6   :  { %2106 = vmatprep.subr.bf16.mxu1 %v2159_v11  ;;  %v2137_v15 = vld [vmem:[%s2384_s0 + $0x50] sm:$0xff]  }
   0x7   :  { %1961 = vmatpush3.bf16.msra.mxu0 %v2126_v1  ;;  %2114 = vmatpush3.bf16.msra.mxu1 %v2159_v11 }
   0x8   :  { %2026 = vmatprep.subr.bf16.mxu0 %v2159_v11  ;;  %2107 = vmatprep.subr.bf16.mxu1 %v2160_v12 }
   0xa   :  { %1963 = vmatmul.mubr.msk.bf16.vlgmr.msra.gmra.mrb[0].mxu0 %vm256_vm0, %v2128_v3 }
   0xb   :  { %1966 = vmatprep.mubr.msk.bf16.mxu0 %vm256_vm0, %v2129_v4  ;;  %2027 = vmatpush3.bf16.msra.mxu0 %v2159_v11 }
   0xc   :  { %2028 = vmatprep.subr.bf16.mxu0 %v2160_v12  ;;  %2115 = vmatpush3.bf16.msra.mxu1 %v2160_v12 }
   0xf   :  { %2029 = vmatpush3.bf16.msra.mxu0 %v2160_v12 }
  0x12   :  { %1967 = vmatmul.mubr.msk.bf16.gmra.mrb[4].mxu0 %vm256_vm0, %v2130_v5 }
  0x13   :  { %1970 = vmatprep.mubr.msk.bf16.mxu0 %vm256_vm0, %v2131_v6 }
  0x1a   :  { %1971 = vmatmul.mubr.msk.bf16.gmra.mrb[8].mxu0 %vm256_vm0, %v2132_v7 }
  0x1b   :  { %1974 = vmatprep.mubr.msk.bf16.mxu0 %vm256_vm0, %v2133_v8 }
  0x22   :  { %1975 = vmatmul.mubr.msk.bf16.gmra.mrb[12].mxu0 %vm256_vm0, %v2134_v9 }
  0x23   :  { %1978 = vmatprep.mubr.msk.bf16.mxu0 %vm256_vm0, %v2135_v10 }
  0x24   :  { %8 = vsyncpa [#allocation3], 0  ;;  %2030 = vmatprep.subr.bf16.mxu0 %v2161_v14  ;;  %v2162_v16 = vld [vmem:[%s2386_s2 + $0x18] sm:$0xff]   ;;  %2108 = vmatprep.subr.bf16.mxu1 %v2161_v14  ;;  %v2163_v18 = vld [vmem:[%s2386_s2 + $0x20] sm:$0xff]  }
  0x25   :  { %2031 = vmatpush3.bf16.msra.mxu0 %v2161_v14  ;;  %2116 = vmatpush3.bf16.msra.mxu1 %v2161_v14  ;;  %v2138_v17 = vld [vmem:[%s2384_s0 + $0x58] sm:$0xff]   ;;  %v2139_v19 = vld [vmem:[%s2384_s0 + $0x60] sm:$0xff]   ;;  %v2164_v20 = vld [vmem:[%s2386_s2 + $0x28] sm:$0xff]  }
  0x26   :  { %2032 = vmatprep.subr.bf16.mxu0 %v2162_v16  ;;  %2109 = vmatprep.subr.bf16.mxu1 %v2162_v16  ;;  %v2140_v21 = vld [vmem:[%s2384_s0 + $0x68] sm:$0xff]   ;;  %v2141_v22 = vld [vmem:[%s2384_s0 + $0x70] sm:$0xff]   ;;  %v2142_v23 = vld [vmem:[%s2384_s0 + $0x78] sm:$0xff]  }
  0x27   :  { %v2143_v24 = vld [vmem:[%s2384_s0 + $0x80] sm:$0xff]   ;;  %v2144_v25 = vld [vmem:[%s2384_s0 + $0x88] sm:$0xff]   ;;  %v2145_v26 = vld [vmem:[%s2384_s0 + $0x90] sm:$0xff]  }
  0x28   :  { %v2146_v27 = vld [vmem:[%s2384_s0 + $0x98] sm:$0xff]   ;;  %v2147_v28 = vld [vmem:[%s2384_s0 + $0xa0] sm:$0xff]   ;;  %v2148_v29 = vld [vmem:[%s2384_s0 + $0xa8] sm:$0xff]  }
  0x29   :  { %2033 = vmatpush3.bf16.msra.mxu0 %v2162_v16  ;;  %2117 = vmatpush3.bf16.msra.mxu1 %v2162_v16  ;;  %v2149_v30 = vld [vmem:[%s2384_s0 + $0xb0] sm:$0xff]   ;;  %v2150_v32 = vld [vmem:[%s2384_s0 + $0xb8] sm:$0xff]   ;;  %v2151_v33 = vld [vmem:[%s2384_s0 + $0xc0] sm:$0xff]  }
  0x2a   :  { %1979 = vmatmul.mubr.msk.bf16.gmra.mrb[16].mxu0 %vm256_vm0, %v2136_v13  ;;  %2034 = vmatprep.subr.bf16.mxu0 %v2163_v18  ;;  %v2165_v31 = vld [vmem:[%s2386_s2 + $0x30] sm:$0xff]   ;;  %v2166_v34 = vld [vmem:[%s2386_s2 + $0x38] sm:$0xff]   ;;  %v2152_v35 = vld [vmem:[%s2384_s0 + $0xc8] sm:$0xff]  }
  0x2b   :  { %1982 = vmatprep.mubr.msk.bf16.mxu0 %vm256_vm0, %v2137_v15  ;;  %2110 = vmatprep.subr.bf16.mxu1 %v2163_v18  ;;  %v2153_v36 = vld [vmem:[%s2384_s0 + $0xd0] sm:$0xff]   ;;  %v2154_v37 = vld [vmem:[%s2384_s0 + $0xd8] sm:$0xff]   ;;  %v2155_v38 = vld [vmem:[%s2384_s0 + $0xe0] sm:$0xff]  }
  0x2c   :  { %v2156_v39 = vld [vmem:[%s2384_s0 + $0xe8] sm:$0xff]   ;;  %v2157_v40 = vld [vmem:[%s2384_s0 + $0xf0] sm:$0xff]   ;;  %v2158_v41 = vld [vmem:[%s2384_s0 + $0xf8] sm:$0xff]   ;;  %s2191_s0 = smov [#allocation2]  }
  0x2d   :  { %2035 = vmatpush3.bf16.msra.mxu0 %v2163_v18  ;;  %2118 = vmatpush3.bf16.msra.mxu1 %v2163_v18  ;;  %s1480_s11 = sshll.u32 %s2191_s0, 4  ;;  %s1481_s11 = int_to_ptr.vmem [resolvable:$true] %s1480_s11 }
  0x2e   :  { %2036 = vmatprep.subr.bf16.mxu0 %v2164_v20  ;;  %2111 = vmatprep.subr.bf16.mxu1 %v2164_v20  ;;  %s2167_s12 = scalar_lea.vmem %s1481_s11, 4096  ;;  %p2172_p1 = scmp.lt.s32.totalorder %s1481_s11, %s1481_s11 }
  0x2f   :  { %p2168_p0 = scmp.ne.s32.totalorder %s1481_s11, %s2167_s12  ;;  %p2173_p2 = scmp.lt.s32.totalorder %s2167_s12, %s2167_s12 }
  0x31   :  { %2037 = vmatpush3.bf16.msra.mxu0 %v2164_v20  ;;  %2119 = vmatpush3.bf16.msra.mxu1 %v2164_v20  ;;  %p2174_p3 = por %p2173_p2, %p2172_p1 }
  0x32   :  { %1983 = vmatmul.mubr.msk.bf16.gmra.mrb[20].mxu0 %vm256_vm0, %v2138_v17  ;;  %2038 = vmatprep.subr.bf16.mxu0 %v2165_v31 }
  0x33   :  { %1986 = vmatprep.mubr.msk.bf16.mxu0 %vm256_vm0, %v2139_v19  ;;  %2112 = vmatprep.subr.bf16.mxu1 %v2165_v31  ;;  %p2175_p4 = pnand %p2174_p3, %p2168_p0 }
  0x35   :  { %2039 = vmatpush3.bf16.msra.mxu0 %v2165_v31  ;;  %2120 = vmatpush3.bf16.msra.mxu1 %v2165_v31 }
  0x36   :  { %2040 = vmatprep.subr.bf16.mxu0 %v2166_v34  ;;  %2113 = vmatprep.subr.bf16.mxu1 %v2166_v34 }
  0x39   :  { %2041 = vmatpush3.bf16.msra.mxu0 %v2166_v34  ;;  %2121 = vmatpush3.bf16.msra.mxu1 %v2166_v34 }
  0x3a   :  { %1987 = vmatmul.mubr.msk.bf16.gmra.mrb[24].mxu0 %vm256_vm0, %v2140_v21 }
  0x3b   :  { %1990 = vmatprep.mubr.msk.bf16.mxu0 %vm256_vm0, %v2141_v22 }
  0x42   :  { %1991 = vmatmul.mubr.msk.bf16.gmra.mrb[28].mxu0 %vm256_vm0, %v2142_v23 }
  0x43   :  { %1994 = vmatprep.mubr.msk.bf16.mxu0 %vm256_vm0, %v2143_v24 }
  0x4a   :  { %1995 = vmatmul.mubr.msk.bf16.gmra.mrb[32].mxu0 %vm256_vm0, %v2144_v25 }
  0x4b   :  { %1998 = vmatprep.mubr.msk.bf16.mxu0 %vm256_vm0, %v2145_v26 }
  0x52   :  { %1999 = vmatmul.mubr.msk.bf16.gmra.mrb[36].mxu0 %vm256_vm0, %v2146_v27 }
  0x53   :  { %2002 = vmatprep.mubr.msk.bf16.mxu0 %vm256_vm0, %v2147_v28 }
  0x5a   :  { %2003 = vmatmul.mubr.msk.bf16.gmra.mrb[40].mxu0 %vm256_vm0, %v2148_v29 }
  0x5b   :  { %2006 = vmatprep.mubr.msk.bf16.mxu0 %vm256_vm0, %v2149_v30 }
  0x62   :  { %2007 = vmatmul.mubr.msk.bf16.gmra.mrb[44].mxu0 %vm256_vm0, %v2150_v32 }
  0x63   :  { %2010 = vmatprep.mubr.msk.bf16.mxu0 %vm256_vm0, %v2151_v33 }
  0x6a   :  { %2011 = vmatmul.mubr.msk.bf16.gmra.mrb[48].mxu0 %vm256_vm0, %v2152_v35 }
  0x6b   :  { %2014 = vmatprep.mubr.msk.bf16.mxu0 %vm256_vm0, %v2153_v36 }
  0x72   :  { %2015 = vmatmul.mubr.msk.bf16.gmra.mrb[52].mxu0 %vm256_vm0, %v2154_v37 }
  0x73   :  { %2018 = vmatprep.mubr.msk.bf16.mxu0 %vm256_vm0, %v2155_v38 }
  0x7a   :  { %2019 = vmatmul.mubr.msk.bf16.gmra.mrb[56].mxu0 %vm256_vm0, %v2156_v39 }
  0x7b   :  { %2022 = vmatprep.mubr.msk.bf16.mxu0 %vm256_vm0, %v2157_v40 }
  0x82   :  { %2023 = vmatmul.mubr.msk.bf16.gmra.mrb[60].mxu0 %vm256_vm0, %v2158_v41 }
  0xdd   :  { %v1964_v42 = vpop.f32.mrb[0].mxu0 }
  0xde   :  { %v387_v43 = vpop.f32.mrb[1].mxu0  ;;  %v644_v45 = vmax.f32 %v1964_v42, 0.0 }
  0xdf   :  { %v1965_v44 = vpop.f32.mrb[2].mxu0  ;;  %v642_v48 = vmax.f32 %v387_v43, 0.0 }
  0xe0   :  { %v645_v46 = vmax.f32 %v1965_v44, 0.0  ;;  %v390_v47 = vpop.f32.mrb[3].mxu0 }
  0xe1   :  { %v643_v49 = vmax.f32 %v390_v47, 0.0 }
  0xe2   :  { %v707_v50 = vpack.c.bf16 %v645_v46, %v644_v45 }
  0xe3   :  { %v706_v51 = vpack.c.bf16 %v643_v49, %v642_v48 }
  0xe5   :  { %v1968_v52 = vpop.f32.mrb[4].mxu0  ;;  %2042 = vmatprep.mubr.bf16.mxu0 %v706_v51 }
  0xe6   :  { %v403_v53 = vpop.f32.mrb[5].mxu0  ;;  %2043 = vmatmul.mubr.bf16.vlgmr.msra.gmra.mrb[64].mxu0 %v707_v50  ;;  %v648_v55 = vmax.f32 %v1968_v52, 0.0 }
  0xe7   :  { %v1969_v54 = vpop.f32.mrb[6].mxu0  ;;  %v646_v58 = vmax.f32 %v403_v53, 0.0 }
  0xe8   :  { %v649_v56 = vmax.f32 %v1969_v54, 0.0  ;;  %v406_v57 = vpop.f32.mrb[7].mxu0 }
  0xe9   :  { %v647_v59 = vmax.f32 %v406_v57, 0.0 }
  0xea   :  { %v709_v60 = vpack.c.bf16 %v649_v56, %v648_v55 }
  0xeb   :  { %v708_v61 = vpack.c.bf16 %v647_v59, %v646_v58 }
  0xed   :  { %v1972_v62 = vpop.f32.mrb[8].mxu0  ;;  %2046 = vmatprep.mubr.bf16.mxu1 %v708_v61 }
  0xee   :  { %v419_v63 = vpop.f32.mrb[9].mxu0  ;;  %2047 = vmatmul.mubr.bf16.vlgmr.msra.gmra.mrb[0].mxu1 %v709_v60  ;;  %v652_v1 = vmax.f32 %v1972_v62, 0.0 }
  0xef   :  { %v1973_v0 = vpop.f32.mrb[10].mxu0  ;;  %v650_v4 = vmax.f32 %v419_v63, 0.0 }
  0xf0   :  { %v653_v2 = vmax.f32 %v1973_v0, 0.0  ;;  %v422_v3 = vpop.f32.mrb[11].mxu0 }
  0xf1   :  { %v651_v5 = vmax.f32 %v422_v3, 0.0 }
  0xf2   :  { %v711_v6 = vpack.c.bf16 %v653_v2, %v652_v1 }
  0xf3   :  { %v710_v7 = vpack.c.bf16 %v651_v5, %v650_v4 }
  0xf5   :  { %v1976_v8 = vpop.f32.mrb[12].mxu0  ;;  %2050 = vmatprep.mubr.bf16.mxu1 %v710_v7 }
  0xf6   :  { %v435_v9 = vpop.f32.mrb[13].mxu0  ;;  %2051 = vmatmul.mubr.bf16.gmra.mrb[4].mxu1 %v711_v6  ;;  %v656_v11 = vmax.f32 %v1976_v8, 0.0 }
  0xf7   :  { %v1977_v10 = vpop.f32.mrb[14].mxu0  ;;  %v654_v14 = vmax.f32 %v435_v9, 0.0 }
  0xf8   :  { %v657_v12 = vmax.f32 %v1977_v10, 0.0  ;;  %v438_v13 = vpop.f32.mrb[15].mxu0 }
  0xf9   :  { %v655_v15 = vmax.f32 %v438_v13, 0.0 }
  0xfa   :  { %v713_v16 = vpack.c.bf16 %v657_v12, %v656_v11 }
  0xfb   :  { %v712_v17 = vpack.c.bf16 %v655_v15, %v654_v14 }
  0xfd   :  { %v1980_v18 = vpop.f32.mrb[16].mxu0  ;;  %2054 = vmatprep.mubr.bf16.mxu1 %v712_v17 }
  0xfe   :  { %v451_v19 = vpop.f32.mrb[17].mxu0  ;;  %2055 = vmatmul.mubr.bf16.gmra.mrb[8].mxu1 %v713_v16  ;;  %v660_v21 = vmax.f32 %v1980_v18, 0.0 }
  0xff   :  { %v1981_v20 = vpop.f32.mrb[18].mxu0  ;;  %v658_v24 = vmax.f32 %v451_v19, 0.0 }
 0x100   :  { %v661_v22 = vmax.f32 %v1981_v20, 0.0  ;;  %v454_v23 = vpop.f32.mrb[19].mxu0 }
 0x101   :  { %v659_v25 = vmax.f32 %v454_v23, 0.0 }
 0x102   :  { %v715_v26 = vpack.c.bf16 %v661_v22, %v660_v21 }
 0x103   :  { %v714_v27 = vpack.c.bf16 %v659_v25, %v658_v24 }
 0x105   :  { %v1984_v28 = vpop.f32.mrb[20].mxu0  ;;  %2058 = vmatprep.mubr.bf16.mxu1 %v714_v27 }
 0x106   :  { %v467_v29 = vpop.f32.mrb[21].mxu0  ;;  %2059 = vmatmul.mubr.bf16.gmra.mrb[12].mxu1 %v715_v26  ;;  %v664_v31 = vmax.f32 %v1984_v28, 0.0 }
 0x107   :  { %v1985_v30 = vpop.f32.mrb[22].mxu0  ;;  %v662_v34 = vmax.f32 %v467_v29, 0.0 }
 0x108   :  { %v665_v32 = vmax.f32 %v1985_v30, 0.0  ;;  %v470_v33 = vpop.f32.mrb[23].mxu0 }
 0x109   :  { %v663_v35 = vmax.f32 %v470_v33, 0.0 }
 0x10a   :  { %v717_v36 = vpack.c.bf16 %v665_v32, %v664_v31 }
 0x10b   :  { %v716_v37 = vpack.c.bf16 %v663_v35, %v662_v34 }
 0x10d   :  { %v1988_v38 = vpop.f32.mrb[24].mxu0  ;;  %2062 = vmatprep.mubr.bf16.mxu1 %v716_v37 }
 0x10e   :  { %v483_v39 = vpop.f32.mrb[25].mxu0  ;;  %2063 = vmatmul.mubr.bf16.gmra.mrb[16].mxu1 %v717_v36  ;;  %v668_v41 = vmax.f32 %v1988_v38, 0.0 }
 0x10f   :  { %v1989_v40 = vpop.f32.mrb[26].mxu0  ;;  %v666_v44 = vmax.f32 %v483_v39, 0.0 }
 0x110   :  { %v669_v42 = vmax.f32 %v1989_v40, 0.0  ;;  %v486_v43 = vpop.f32.mrb[27].mxu0 }
 0x111   :  { %v667_v45 = vmax.f32 %v486_v43, 0.0 }
 0x112   :  { %v719_v46 = vpack.c.bf16 %v669_v42, %v668_v41 }
 0x113   :  { %v718_v47 = vpack.c.bf16 %v667_v45, %v666_v44 }
 0x115   :  { %v1992_v48 = vpop.f32.mrb[28].mxu0  ;;  %2066 = vmatprep.mubr.bf16.mxu1 %v718_v47 }
 0x116   :  { %v499_v49 = vpop.f32.mrb[29].mxu0  ;;  %2067 = vmatmul.mubr.bf16.gmra.mrb[20].mxu1 %v719_v46  ;;  %v672_v51 = vmax.f32 %v1992_v48, 0.0 }
 0x117   :  { %v1993_v50 = vpop.f32.mrb[30].mxu0  ;;  %v670_v54 = vmax.f32 %v499_v49, 0.0 }
 0x118   :  { %v673_v52 = vmax.f32 %v1993_v50, 0.0  ;;  %v502_v53 = vpop.f32.mrb[31].mxu0 }
 0x119   :  { %v671_v55 = vmax.f32 %v502_v53, 0.0 }
 0x11a   :  { %v721_v56 = vpack.c.bf16 %v673_v52, %v672_v51 }
 0x11b   :  { %v720_v57 = vpack.c.bf16 %v671_v55, %v670_v54 }
 0x11d   :  { %v1996_v58 = vpop.f32.mrb[32].mxu0  ;;  %2070 = vmatprep.mubr.bf16.mxu1 %v720_v57 }
 0x11e   :  { %v515_v59 = vpop.f32.mrb[33].mxu0  ;;  %2071 = vmatmul.mubr.bf16.gmra.mrb[24].mxu1 %v721_v56  ;;  %v676_v61 = vmax.f32 %v1996_v58, 0.0 }
 0x11f   :  { %v1997_v60 = vpop.f32.mrb[34].mxu0  ;;  %v674_v0 = vmax.f32 %v515_v59, 0.0 }
 0x120   :  { %v677_v62 = vmax.f32 %v1997_v60, 0.0  ;;  %v518_v63 = vpop.f32.mrb[35].mxu0 }
 0x121   :  { %v675_v1 = vmax.f32 %v518_v63, 0.0 }
 0x122   :  { %v723_v2 = vpack.c.bf16 %v677_v62, %v676_v61 }
 0x123   :  { %v722_v3 = vpack.c.bf16 %v675_v1, %v674_v0 }
 0x125   :  { %v2000_v4 = vpop.f32.mrb[36].mxu0  ;;  %2074 = vmatprep.mubr.bf16.mxu1 %v722_v3 }
 0x126   :  { %v531_v5 = vpop.f32.mrb[37].mxu0  ;;  %2075 = vmatmul.mubr.bf16.gmra.mrb[28].mxu1 %v723_v2  ;;  %v680_v7 = vmax.f32 %v2000_v4, 0.0 }
 0x127   :  { %v2001_v6 = vpop.f32.mrb[38].mxu0  ;;  %v678_v10 = vmax.f32 %v531_v5, 0.0 }
 0x128   :  { %v681_v8 = vmax.f32 %v2001_v6, 0.0  ;;  %v534_v9 = vpop.f32.mrb[39].mxu0 }
 0x129   :  { %v679_v11 = vmax.f32 %v534_v9, 0.0 }
 0x12a   :  { %v725_v12 = vpack.c.bf16 %v681_v8, %v680_v7 }
 0x12b   :  { %v724_v13 = vpack.c.bf16 %v679_v11, %v678_v10 }
 0x12d   :  { %v2004_v14 = vpop.f32.mrb[40].mxu0  ;;  %2078 = vmatprep.mubr.bf16.mxu1 %v724_v13 }
 0x12e   :  { %v547_v15 = vpop.f32.mrb[41].mxu0  ;;  %2079 = vmatmul.mubr.bf16.gmra.mrb[32].mxu1 %v725_v12  ;;  %v684_v17 = vmax.f32 %v2004_v14, 0.0 }
 0x12f   :  { %v2005_v16 = vpop.f32.mrb[42].mxu0  ;;  %v682_v20 = vmax.f32 %v547_v15, 0.0 }
 0x130   :  { %v685_v18 = vmax.f32 %v2005_v16, 0.0  ;;  %v550_v19 = vpop.f32.mrb[43].mxu0 }
 0x131   :  { %v683_v21 = vmax.f32 %v550_v19, 0.0 }
 0x132   :  { %v727_v22 = vpack.c.bf16 %v685_v18, %v684_v17 }
 0x133   :  { %v726_v23 = vpack.c.bf16 %v683_v21, %v682_v20 }
 0x135   :  { %v2008_v24 = vpop.f32.mrb[44].mxu0  ;;  %2082 = vmatprep.mubr.bf16.mxu1 %v726_v23 }
 0x136   :  { %v563_v25 = vpop.f32.mrb[45].mxu0  ;;  %2083 = vmatmul.mubr.bf16.gmra.mrb[36].mxu1 %v727_v22  ;;  %v688_v27 = vmax.f32 %v2008_v24, 0.0 }
 0x137   :  { %v2009_v26 = vpop.f32.mrb[46].mxu0  ;;  %v686_v30 = vmax.f32 %v563_v25, 0.0 }
 0x138   :  { %v689_v28 = vmax.f32 %v2009_v26, 0.0  ;;  %v566_v29 = vpop.f32.mrb[47].mxu0 }
 0x139   :  { %v687_v31 = vmax.f32 %v566_v29, 0.0 }
 0x13a   :  { %v729_v32 = vpack.c.bf16 %v689_v28, %v688_v27 }
 0x13b   :  { %v728_v33 = vpack.c.bf16 %v687_v31, %v686_v30 }
 0x13d   :  { %v2012_v34 = vpop.f32.mrb[48].mxu0  ;;  %2086 = vmatprep.mubr.bf16.mxu1 %v728_v33 }
 0x13e   :  { %v579_v35 = vpop.f32.mrb[49].mxu0  ;;  %2087 = vmatmul.mubr.bf16.gmra.mrb[40].mxu1 %v729_v32  ;;  %v692_v37 = vmax.f32 %v2012_v34, 0.0 }
 0x13f   :  { %v2013_v36 = vpop.f32.mrb[50].mxu0  ;;  %v690_v40 = vmax.f32 %v579_v35, 0.0 }
 0x140   :  { %v693_v38 = vmax.f32 %v2013_v36, 0.0  ;;  %v582_v39 = vpop.f32.mrb[51].mxu0 }
 0x141   :  { %v691_v41 = vmax.f32 %v582_v39, 0.0 }
 0x142   :  { %v731_v42 = vpack.c.bf16 %v693_v38, %v692_v37 }
 0x143   :  { %v730_v43 = vpack.c.bf16 %v691_v41, %v690_v40 }
 0x145   :  { %v2016_v44 = vpop.f32.mrb[52].mxu0  ;;  %2090 = vmatprep.mubr.bf16.mxu1 %v730_v43 }
 0x146   :  { %v595_v45 = vpop.f32.mrb[53].mxu0  ;;  %2091 = vmatmul.mubr.bf16.gmra.mrb[44].mxu1 %v731_v42  ;;  %v696_v47 = vmax.f32 %v2016_v44, 0.0 }
 0x147   :  { %v2017_v46 = vpop.f32.mrb[54].mxu0  ;;  %v694_v50 = vmax.f32 %v595_v45, 0.0 }
 0x148   :  { %v697_v48 = vmax.f32 %v2017_v46, 0.0  ;;  %v598_v49 = vpop.f32.mrb[55].mxu0 }
 0x149   :  { %v695_v51 = vmax.f32 %v598_v49, 0.0 }
 0x14a   :  { %v733_v52 = vpack.c.bf16 %v697_v48, %v696_v47 }
 0x14b   :  { %v732_v53 = vpack.c.bf16 %v695_v51, %v694_v50 }
 0x14d   :  { %v2020_v54 = vpop.f32.mrb[56].mxu0  ;;  %2094 = vmatprep.mubr.bf16.mxu1 %v732_v53 }
 0x14e   :  { %v611_v55 = vpop.f32.mrb[57].mxu0  ;;  %2095 = vmatmul.mubr.bf16.gmra.mrb[48].mxu1 %v733_v52  ;;  %v700_v57 = vmax.f32 %v2020_v54, 0.0 }
 0x14f   :  { %v2021_v56 = vpop.f32.mrb[58].mxu0  ;;  %v698_v60 = vmax.f32 %v611_v55, 0.0 }
 0x150   :  { %v701_v58 = vmax.f32 %v2021_v56, 0.0  ;;  %v614_v59 = vpop.f32.mrb[59].mxu0 }
 0x151   :  { %v699_v61 = vmax.f32 %v614_v59, 0.0 }
 0x152   :  { %v735_v62 = vpack.c.bf16 %v701_v58, %v700_v57 }
 0x153   :  { %v734_v63 = vpack.c.bf16 %v699_v61, %v698_v60 }
 0x155   :  { %v2024_v0 = vpop.f32.mrb[60].mxu0  ;;  %2098 = vmatprep.mubr.bf16.mxu1 %v734_v63 }
 0x156   :  { %v627_v1 = vpop.f32.mrb[61].mxu0  ;;  %2099 = vmatmul.mubr.bf16.gmra.mrb[52].mxu1 %v735_v62  ;;  %v704_v3 = vmax.f32 %v2024_v0, 0.0 }
 0x157   :  { %v2025_v2 = vpop.f32.mrb[62].mxu0  ;;  %v702_v6 = vmax.f32 %v627_v1, 0.0 }
 0x158   :  { %v705_v4 = vmax.f32 %v2025_v2, 0.0  ;;  %v630_v5 = vpop.f32.mrb[63].mxu0 }
 0x159   :  { %v703_v7 = vmax.f32 %v630_v5, 0.0 }
 0x15a   :  { %v737_v8 = vpack.c.bf16 %v705_v4, %v704_v3 }
 0x15b   :  { %v736_v9 = vpack.c.bf16 %v703_v7, %v702_v6 }
 0x15d   :  { %2102 = vmatprep.mubr.bf16.mxu1 %v736_v9 }
 0x15e   :  { %2103 = vmatmul.mubr.bf16.gmra.mrb[56].mxu1 %v737_v8 }
 0x1b9   :  { %v2044_v10 = vpop.f32.mrb[64].mxu0 }
 0x1ba   :  { %v836_v11 = vpop.f32.mrb[65].mxu0  ;;  %v1093_v13 = vmax.f32 %v2044_v10, 0.0 }
 0x1bb   :  { %v2045_v12 = vpop.f32.mrb[66].mxu0  ;;  %v1091_v16 = vmax.f32 %v836_v11, 0.0 }
 0x1bc   :  { %v1094_v14 = vmax.f32 %v2045_v12, 0.0  ;;  %v839_v15 = vpop.f32.mrb[67].mxu0 }
 0x1bd   :  { %v1092_v17 = vmax.f32 %v839_v15, 0.0 }
 0x1be   :  { %v1701_v18 = vpack.c.bf16 %v1094_v14, %v1093_v13 }
 0x1bf   :  { %v1696_v19 = vpack.c.bf16 %v1092_v17, %v1091_v16 }
 0x1c0   :  { %1853 = vst [vmem:[#allocation2 + $0x8] sm:$0xff] %v1701_v18  }
 0x1c1   :  { %1697 = vst [vmem:[#allocation2] sm:$0xff] %v1696_v19   ;;  %v2048_v20 = vpop.f32.mrb[0].mxu1 }
 0x1c2   :  { %v852_v21 = vpop.f32.mrb[1].mxu1  ;;  %v1097_v23 = vmax.f32 %v2048_v20, 0.0 }
 0x1c3   :  { %v2049_v22 = vpop.f32.mrb[2].mxu1  ;;  %v1095_v26 = vmax.f32 %v852_v21, 0.0 }
 0x1c4   :  { %v1098_v24 = vmax.f32 %v2049_v22, 0.0  ;;  %v855_v25 = vpop.f32.mrb[3].mxu1 }
 0x1c5   :  { %v1096_v27 = vmax.f32 %v855_v25, 0.0 }
 0x1c6   :  { %v1711_v28 = vpack.c.bf16 %v1098_v24, %v1097_v23 }
 0x1c7   :  { %v1706_v29 = vpack.c.bf16 %v1096_v27, %v1095_v26 }
 0x1c8   :  { %1855 = vst [vmem:[#allocation2 + $0x18] sm:$0xff] %v1711_v28  }
 0x1c9   :  { %1854 = vst [vmem:[#allocation2 + $0x10] sm:$0xff] %v1706_v29   ;;  %v2052_v30 = vpop.f32.mrb[4].mxu1 }
 0x1ca   :  { %v868_v31 = vpop.f32.mrb[5].mxu1  ;;  %v1101_v33 = vmax.f32 %v2052_v30, 0.0 }
 0x1cb   :  { %v2053_v32 = vpop.f32.mrb[6].mxu1  ;;  %v1099_v36 = vmax.f32 %v868_v31, 0.0 }
 0x1cc   :  { %v1102_v34 = vmax.f32 %v2053_v32, 0.0  ;;  %v871_v35 = vpop.f32.mrb[7].mxu1 }
 0x1cd   :  { %v1100_v37 = vmax.f32 %v871_v35, 0.0 }
 0x1ce   :  { %v1721_v38 = vpack.c.bf16 %v1102_v34, %v1101_v33 }
 0x1cf   :  { %v1716_v39 = vpack.c.bf16 %v1100_v37, %v1099_v36 }
 0x1d0   :  { %1857 = vst [vmem:[#allocation2 + $0x28] sm:$0xff] %v1721_v38  }
 0x1d1   :  { %1856 = vst [vmem:[#allocation2 + $0x20] sm:$0xff] %v1716_v39   ;;  %v2056_v40 = vpop.f32.mrb[8].mxu1 }
 0x1d2   :  { %v884_v41 = vpop.f32.mrb[9].mxu1  ;;  %v1105_v43 = vmax.f32 %v2056_v40, 0.0 }
 0x1d3   :  { %v2057_v42 = vpop.f32.mrb[10].mxu1  ;;  %v1103_v46 = vmax.f32 %v884_v41, 0.0 }
 0x1d4   :  { %v1106_v44 = vmax.f32 %v2057_v42, 0.0  ;;  %v887_v45 = vpop.f32.mrb[11].mxu1 }
 0x1d5   :  { %v1104_v47 = vmax.f32 %v887_v45, 0.0 }
 0x1d6   :  { %v1731_v48 = vpack.c.bf16 %v1106_v44, %v1105_v43 }
 0x1d7   :  { %v1726_v49 = vpack.c.bf16 %v1104_v47, %v1103_v46 }
 0x1d8   :  { %1859 = vst [vmem:[#allocation2 + $0x38] sm:$0xff] %v1731_v48  }
 0x1d9   :  { %1858 = vst [vmem:[#allocation2 + $0x30] sm:$0xff] %v1726_v49   ;;  %v2060_v50 = vpop.f32.mrb[12].mxu1 }
 0x1da   :  { %v900_v51 = vpop.f32.mrb[13].mxu1  ;;  %v1109_v53 = vmax.f32 %v2060_v50, 0.0 }
 0x1db   :  { %v2061_v52 = vpop.f32.mrb[14].mxu1  ;;  %v1107_v56 = vmax.f32 %v900_v51, 0.0 }
 0x1dc   :  { %v1110_v54 = vmax.f32 %v2061_v52, 0.0  ;;  %v903_v55 = vpop.f32.mrb[15].mxu1 }
 0x1dd   :  { %v1108_v57 = vmax.f32 %v903_v55, 0.0 }
 0x1de   :  { %v1741_v58 = vpack.c.bf16 %v1110_v54, %v1109_v53 }
 0x1df   :  { %v1736_v59 = vpack.c.bf16 %v1108_v57, %v1107_v56 }
 0x1e0   :  { %1861 = vst [vmem:[#allocation2 + $0x48] sm:$0xff] %v1741_v58  }
 0x1e1   :  { %1860 = vst [vmem:[#allocation2 + $0x40] sm:$0xff] %v1736_v59   ;;  %v2064_v60 = vpop.f32.mrb[16].mxu1 }
 0x1e2   :  { %v916_v61 = vpop.f32.mrb[17].mxu1  ;;  %v1113_v63 = vmax.f32 %v2064_v60, 0.0 }
 0x1e3   :  { %v2065_v62 = vpop.f32.mrb[18].mxu1  ;;  %v1111_v2 = vmax.f32 %v916_v61, 0.0 }
 0x1e4   :  { %v1114_v0 = vmax.f32 %v2065_v62, 0.0  ;;  %v919_v1 = vpop.f32.mrb[19].mxu1 }
 0x1e5   :  { %v1112_v3 = vmax.f32 %v919_v1, 0.0 }
 0x1e6   :  { %v1751_v4 = vpack.c.bf16 %v1114_v0, %v1113_v63 }
 0x1e7   :  { %v1746_v5 = vpack.c.bf16 %v1112_v3, %v1111_v2 }
 0x1e8   :  { %1863 = vst [vmem:[#allocation2 + $0x58] sm:$0xff] %v1751_v4  }
 0x1e9   :  { %1862 = vst [vmem:[#allocation2 + $0x50] sm:$0xff] %v1746_v5   ;;  %v2068_v6 = vpop.f32.mrb[20].mxu1 }
 0x1ea   :  { %v932_v7 = vpop.f32.mrb[21].mxu1  ;;  %v1117_v9 = vmax.f32 %v2068_v6, 0.0 }
 0x1eb   :  { %v2069_v8 = vpop.f32.mrb[22].mxu1  ;;  %v1115_v12 = vmax.f32 %v932_v7, 0.0 }
 0x1ec   :  { %v1118_v10 = vmax.f32 %v2069_v8, 0.0  ;;  %v935_v11 = vpop.f32.mrb[23].mxu1 }
 0x1ed   :  { %v1116_v13 = vmax.f32 %v935_v11, 0.0 }
 0x1ee   :  { %v1761_v14 = vpack.c.bf16 %v1118_v10, %v1117_v9 }
 0x1ef   :  { %v1756_v15 = vpack.c.bf16 %v1116_v13, %v1115_v12 }
 0x1f0   :  { %1865 = vst [vmem:[#allocation2 + $0x68] sm:$0xff] %v1761_v14  }
 0x1f1   :  { %1864 = vst [vmem:[#allocation2 + $0x60] sm:$0xff] %v1756_v15   ;;  %v2072_v16 = vpop.f32.mrb[24].mxu1 }
 0x1f2   :  { %v948_v17 = vpop.f32.mrb[25].mxu1  ;;  %v1121_v19 = vmax.f32 %v2072_v16, 0.0 }
 0x1f3   :  { %v2073_v18 = vpop.f32.mrb[26].mxu1  ;;  %v1119_v22 = vmax.f32 %v948_v17, 0.0 }
 0x1f4   :  { %v1122_v20 = vmax.f32 %v2073_v18, 0.0  ;;  %v951_v21 = vpop.f32.mrb[27].mxu1 }
 0x1f5   :  { %v1120_v23 = vmax.f32 %v951_v21, 0.0 }
 0x1f6   :  { %v1771_v24 = vpack.c.bf16 %v1122_v20, %v1121_v19 }
 0x1f7   :  { %v1766_v25 = vpack.c.bf16 %v1120_v23, %v1119_v22 }
 0x1f8   :  { %1867 = vst [vmem:[#allocation2 + $0x78] sm:$0xff] %v1771_v24  }
 0x1f9   :  { %1866 = vst [vmem:[#allocation2 + $0x70] sm:$0xff] %v1766_v25   ;;  %v2076_v26 = vpop.f32.mrb[28].mxu1 }
 0x1fa   :  { %v964_v27 = vpop.f32.mrb[29].mxu1  ;;  %v1125_v29 = vmax.f32 %v2076_v26, 0.0 }
 0x1fb   :  { %v2077_v28 = vpop.f32.mrb[30].mxu1  ;;  %v1123_v32 = vmax.f32 %v964_v27, 0.0 }
 0x1fc   :  { %v1126_v30 = vmax.f32 %v2077_v28, 0.0  ;;  %v967_v31 = vpop.f32.mrb[31].mxu1 }
 0x1fd   :  { %v1124_v33 = vmax.f32 %v967_v31, 0.0 }
 0x1fe   :  { %v1781_v34 = vpack.c.bf16 %v1126_v30, %v1125_v29 }
 0x1ff   :  { %v1776_v35 = vpack.c.bf16 %v1124_v33, %v1123_v32 }
 0x200   :  { %1869 = vst [vmem:[#allocation2 + $0x88] sm:$0xff] %v1781_v34  }
 0x201   :  { %1868 = vst [vmem:[#allocation2 + $0x80] sm:$0xff] %v1776_v35   ;;  %v2080_v36 = vpop.f32.mrb[32].mxu1 }
 0x202   :  { %v980_v37 = vpop.f32.mrb[33].mxu1  ;;  %v1129_v39 = vmax.f32 %v2080_v36, 0.0 }
 0x203   :  { %v2081_v38 = vpop.f32.mrb[34].mxu1  ;;  %v1127_v42 = vmax.f32 %v980_v37, 0.0 }
 0x204   :  { %v1130_v40 = vmax.f32 %v2081_v38, 0.0  ;;  %v983_v41 = vpop.f32.mrb[35].mxu1 }
 0x205   :  { %v1128_v43 = vmax.f32 %v983_v41, 0.0 }
 0x206   :  { %v1791_v44 = vpack.c.bf16 %v1130_v40, %v1129_v39 }
 0x207   :  { %v1786_v45 = vpack.c.bf16 %v1128_v43, %v1127_v42 }
 0x208   :  { %1871 = vst [vmem:[#allocation2 + $0x98] sm:$0xff] %v1791_v44  }
 0x209   :  { %1870 = vst [vmem:[#allocation2 + $0x90] sm:$0xff] %v1786_v45   ;;  %v2084_v46 = vpop.f32.mrb[36].mxu1 }
 0x20a   :  { %v996_v47 = vpop.f32.mrb[37].mxu1  ;;  %v1133_v49 = vmax.f32 %v2084_v46, 0.0 }
 0x20b   :  { %v2085_v48 = vpop.f32.mrb[38].mxu1  ;;  %v1131_v52 = vmax.f32 %v996_v47, 0.0 }
 0x20c   :  { %v1134_v50 = vmax.f32 %v2085_v48, 0.0  ;;  %v999_v51 = vpop.f32.mrb[39].mxu1 }
 0x20d   :  { %v1132_v53 = vmax.f32 %v999_v51, 0.0 }
 0x20e   :  { %v1801_v54 = vpack.c.bf16 %v1134_v50, %v1133_v49 }
 0x20f   :  { %v1796_v55 = vpack.c.bf16 %v1132_v53, %v1131_v52 }
 0x210   :  { %1873 = vst [vmem:[#allocation2 + $0xa8] sm:$0xff] %v1801_v54  }
 0x211   :  { %1872 = vst [vmem:[#allocation2 + $0xa0] sm:$0xff] %v1796_v55   ;;  %v2088_v56 = vpop.f32.mrb[40].mxu1 }
 0x212   :  { %v1012_v57 = vpop.f32.mrb[41].mxu1  ;;  %v1137_v59 = vmax.f32 %v2088_v56, 0.0 }
 0x213   :  { %v2089_v58 = vpop.f32.mrb[42].mxu1  ;;  %v1135_v62 = vmax.f32 %v1012_v57, 0.0 }
 0x214   :  { %v1138_v60 = vmax.f32 %v2089_v58, 0.0  ;;  %v1015_v61 = vpop.f32.mrb[43].mxu1 }
 0x215   :  { %v1136_v63 = vmax.f32 %v1015_v61, 0.0 }
 0x216   :  { %v1811_v0 = vpack.c.bf16 %v1138_v60, %v1137_v59 }
 0x217   :  { %v1806_v1 = vpack.c.bf16 %v1136_v63, %v1135_v62 }
 0x218   :  { %1875 = vst [vmem:[#allocation2 + $0xb8] sm:$0xff] %v1811_v0  }
 0x219   :  { %1874 = vst [vmem:[#allocation2 + $0xb0] sm:$0xff] %v1806_v1   ;;  %v2092_v2 = vpop.f32.mrb[44].mxu1 }
 0x21a   :  { %v1028_v3 = vpop.f32.mrb[45].mxu1  ;;  %v1141_v5 = vmax.f32 %v2092_v2, 0.0 }
 0x21b   :  { %v2093_v4 = vpop.f32.mrb[46].mxu1  ;;  %v1139_v8 = vmax.f32 %v1028_v3, 0.0 }
 0x21c   :  { %v1142_v6 = vmax.f32 %v2093_v4, 0.0  ;;  %v1031_v7 = vpop.f32.mrb[47].mxu1 }
 0x21d   :  { %v1140_v9 = vmax.f32 %v1031_v7, 0.0 }
 0x21e   :  { %v1821_v10 = vpack.c.bf16 %v1142_v6, %v1141_v5 }
 0x21f   :  { %v1816_v11 = vpack.c.bf16 %v1140_v9, %v1139_v8 }
 0x220   :  { %1877 = vst [vmem:[#allocation2 + $0xc8] sm:$0xff] %v1821_v10  }
 0x221   :  { %1876 = vst [vmem:[#allocation2 + $0xc0] sm:$0xff] %v1816_v11   ;;  %v2096_v12 = vpop.f32.mrb[48].mxu1 }
 0x222   :  { %v1044_v13 = vpop.f32.mrb[49].mxu1  ;;  %v1145_v15 = vmax.f32 %v2096_v12, 0.0 }
 0x223   :  { %v2097_v14 = vpop.f32.mrb[50].mxu1  ;;  %v1143_v18 = vmax.f32 %v1044_v13, 0.0 }
 0x224   :  { %v1146_v16 = vmax.f32 %v2097_v14, 0.0  ;;  %v1047_v17 = vpop.f32.mrb[51].mxu1 }
 0x225   :  { %v1144_v19 = vmax.f32 %v1047_v17, 0.0 }
 0x226   :  { %v1831_v20 = vpack.c.bf16 %v1146_v16, %v1145_v15 }
 0x227   :  { %v1826_v21 = vpack.c.bf16 %v1144_v19, %v1143_v18 }
 0x228   :  { %1879 = vst [vmem:[#allocation2 + $0xd8] sm:$0xff] %v1831_v20  }
 0x229   :  { %1878 = vst [vmem:[#allocation2 + $0xd0] sm:$0xff] %v1826_v21   ;;  %v2100_v22 = vpop.f32.mrb[52].mxu1 }
 0x22a   :  { %v1060_v23 = vpop.f32.mrb[53].mxu1  ;;  %v1149_v25 = vmax.f32 %v2100_v22, 0.0 }
 0x22b   :  { %v2101_v24 = vpop.f32.mrb[54].mxu1  ;;  %v1147_v28 = vmax.f32 %v1060_v23, 0.0 }
 0x22c   :  { %v1150_v26 = vmax.f32 %v2101_v24, 0.0  ;;  %v1063_v27 = vpop.f32.mrb[55].mxu1 }
 0x22d   :  { %v1148_v29 = vmax.f32 %v1063_v27, 0.0 }
 0x22e   :  { %v1841_v30 = vpack.c.bf16 %v1150_v26, %v1149_v25 }
 0x22f   :  { %v1836_v31 = vpack.c.bf16 %v1148_v29, %v1147_v28 }
 0x230   :  { %1881 = vst [vmem:[#allocation2 + $0xe8] sm:$0xff] %v1841_v30  }
 0x231   :  { %1880 = vst [vmem:[#allocation2 + $0xe0] sm:$0xff] %v1836_v31   ;;  %v2104_v32 = vpop.f32.mrb[56].mxu1 }
 0x232   :  { %v1076_v33 = vpop.f32.mrb[57].mxu1  ;;  %v1153_v35 = vmax.f32 %v2104_v32, 0.0 }
 0x233   :  { %v2105_v34 = vpop.f32.mrb[58].mxu1  ;;  %v1151_v38 = vmax.f32 %v1076_v33, 0.0 }
 0x234   :  { %v1154_v36 = vmax.f32 %v2105_v34, 0.0  ;;  %v1079_v37 = vpop.f32.mrb[59].mxu1 }
 0x235   :  { %v1152_v39 = vmax.f32 %v1079_v37, 0.0 }
 0x236   :  { %v1851_v40 = vpack.c.bf16 %v1154_v36, %v1153_v35 }
 0x237   :  { %v1846_v41 = vpack.c.bf16 %v1152_v39, %v1151_v38 }
 0x238   :  { %1883 = vst [vmem:[#allocation2 + $0xf8] sm:$0xff] %v1851_v40  }
 0x239   :  { %1882 = vst [vmem:[#allocation2 + $0xf0] sm:$0xff] %v1846_v41  }
 0x23a   :  { %2178 = shalt.err (!%p2175_p4)
}
 0x23b   :  { %s2179_s15 = scalar_lea.hbm %s2387_s3, 4096 }
 0x23c   :  { %p2180_p5 = scmp.ne.s32.totalorder %s2387_s3, %s2179_s15  ;;  %p2183_p6 = scmp.lt.u32.totalorder %s2179_s15, %s2387_s3 }
 0x23e   :  { %p2185_p7 = pnand %p2183_p6, %p2180_p5 }
 0x240   :  { %2188 = shalt.err (!%p2185_p7)
}
 0x241   :  { %s2192_s20 = smov 64   ;;  %s2193_s21 = smov 4  }
 0x242   :  { %1486 = dma.vmem_to_hbm [thread:$0]  %s1481_s11, 4096, %s2387_s3, [#allocation3], %s2192_s20, %s2192_s20, %s2193_s21  }
 0x243   :  { %2189 = dma.done.wait [#allocation3], 4096  }
 0x244   :  { %2190 = vsyncadd [#allocation3], 4294963200 }
 0x245   :  { %1490 = vsyncpa [#allocation3], 1 }

</bundles_post_ra>
